<compile_context>
chip_gen: v7x
topology: tpu7x:2x2x1
jax: 0.10.0
libtpu: 0.0.40
codegen_flags: <defaults>
</compile_context>

<pallas_src>
import functools

import jax
import jax.numpy as jnp
from jax.experimental import pallas as pl
from jax.experimental.pallas import tpu as pltpu

IN_DIM = 4      # observation features
HIDDEN = 128    # affine1 output width
N_ACT = 2       # action_head outputs
HEAD_ROWS = 8   # fused transposed head rows: [logit0, logit1, value, 0, 0, 0, 0, 0]


def _policy_kernel(xT_ref, w1T_ref, b1T_ref, whT_ref, bhT_ref, out_ref):
    # ---- hidden layer: relu(W1^T @ x^T + b1^T), all f32 ----------------------
    xT = xT_ref[...]                                               # (4, TM)
    hT = jnp.dot(w1T_ref[...], xT, preferred_element_type=jnp.float32)
    hT = jnp.maximum(hT + b1T_ref[...], 0.0)                       # (128, TM)

    # ---- fused actor+critic head: (8,128) @ (128,TM) + (8,1) -----------------
    headT = jnp.dot(whT_ref[...], hT, preferred_element_type=jnp.float32)
    headT = headT + bhT_ref[...]                                   # (8, TM)
    # rows: 0 = logit0, 1 = logit1, 2 = value, 3..7 = 0 (zero-padded weights)

    # ---- closed-form, numerically-stable 2-class softmax ---------------------
    # p0 = softmax([l0, l1])[0] = sigmoid(l0 - l1); clamp so exp never overflows.
    d = jnp.clip(headT[0:1, :] - headT[1:2, :], -60.0, 60.0)       # (1, TM)
    p0 = 1.0 / (1.0 + jnp.exp(-d))                                 # exact divide
    p1 = 1.0 - p0

    # ---- assemble lane-dense (8, TM) output slab: [p0, p1, value, 0...] ------
    sub = jax.lax.broadcasted_iota(jnp.int32, headT.shape, 0)
    out = jnp.where(sub == 0, p0, jnp.where(sub == 1, p1, headT))
    out_ref[...] = out.astype(out_ref.dtype)


def _round_up(n, m):
    return ((n + m - 1) // m) * m


def prepare_params(w1, b1, w2, b2, w3, b3):
    """One-time parameter prep (hoisted out of the per-call path).

    Returns the transposed first layer and the fused, zero-padded, transposed
    actor+critic head used by the kernel (all f32).
    """
    w1 = jnp.asarray(w1, jnp.float32)
    w1T = w1.T                                                     # (128, 4)
    b1T = jnp.asarray(b1, jnp.float32).reshape(1, HIDDEN).T        # (128, 1)
    pad_rows = HEAD_ROWS - N_ACT - 1
    whT = jnp.concatenate(
        [jnp.asarray(w2, jnp.float32).T,                           # (2, 128)
         jnp.asarray(w3, jnp.float32).T,                           # (1, 128)
         jnp.zeros((pad_rows, HIDDEN), jnp.float32)], axis=0)      # (8, 128)
    bhT = jnp.concatenate(
        [jnp.asarray(b2, jnp.float32).reshape(1, N_ACT).T,         # (2, 1)
         jnp.asarray(b3, jnp.float32).reshape(1, 1).T,             # (1, 1)
         jnp.zeros((pad_rows, 1), jnp.float32)], axis=0)           # (8, 1)
    return w1T, b1T, whT, bhT


@functools.partial(jax.jit, static_argnames=("tm",))
def policy_forward(x, w1T, b1T, whT, bhT, *, tm=2048):
    """x: (B, 4) f32 -> (action_prob (B, 2), state_values (B, 1)), both f32.

    w1T/b1T/whT/bhT come from prepare_params() (computed once, reused).
    """
    B = x.shape[0]
    x = x.astype(jnp.float32)

    # Batch tile: single step for B <= tm; otherwise derive TM from the step
    # count (bounds tail padding), keep TM a multiple of 128 (lane-dense output
    # tiles) and an even step count (v7x megacore on the "parallel" axis).
    if B <= tm:
        TM = _round_up(B, 8)
    else:
        nsteps = -(-B // tm)
        if nsteps % 2:
            nsteps += 1
        TM = _round_up(-(-B // nsteps), 128)
    nsteps = -(-B // TM)
    Bp = nsteps * TM

    xT = x.T                                                       # (4, B)
    if Bp != B:
        xT = jnp.pad(xT, ((0, 0), (0, Bp - B)))

    out = pl.pallas_call(
        _policy_kernel,
        out_shape=jax.ShapeDtypeStruct((HEAD_ROWS, Bp), jnp.float32),
        grid=(nsteps,),
        in_specs=[
            pl.BlockSpec((IN_DIM, TM), lambda i: (0, i)),          # x^T tile
            pl.BlockSpec((HIDDEN, IN_DIM), lambda i: (0, 0)),      # W1^T
            pl.BlockSpec((HIDDEN, 1), lambda i: (0, 0)),           # b1^T
            pl.BlockSpec((HEAD_ROWS, HIDDEN), lambda i: (0, 0)),   # fused head W^T
            pl.BlockSpec((HEAD_ROWS, 1), lambda i: (0, 0)),        # fused head b^T
        ],
        out_specs=pl.BlockSpec((HEAD_ROWS, TM), lambda i: (0, i)),
        compiler_params=pltpu.CompilerParams(
            dimension_semantics=("parallel",)),                    # megacore on v7x
    )(xT, w1T, b1T, whT, bhT)

    action_prob = out[0:N_ACT, :B].T                               # (B, 2)
    state_values = out[N_ACT:N_ACT + 1, :B].T                      # (B, 1)
    return action_prob, state_values


def init_params(key):
    """Deterministic PyTorch-style (uniform +/- 1/sqrt(fan_in)) init."""
    ks = jax.random.split(key, 6)

    def linear(kw, kb, fan_in, fan_out):
        bound = 1.0 / jnp.sqrt(fan_in)
        w = jax.random.uniform(kw, (fan_in, fan_out), jnp.float32, -bound, bound)
        b = jax.random.uniform(kb, (1, fan_out), jnp.float32, -bound, bound)
        return w, b

    w1, b1 = linear(ks[0], ks[1], IN_DIM, HIDDEN)    # affine1
    w2, b2 = linear(ks[2], ks[3], HIDDEN, N_ACT)     # action_head
    w3, b3 = linear(ks[4], ks[5], HIDDEN, 1)         # value_head
    return w1, b1, w2, b2, w3, b3


def _reference(x, w1, b1, w2, b2, w3, b3):
    """Plain-JAX reference matching the PyTorch forward."""
    h = jnp.maximum(x @ w1 + b1, 0.0)
    logits = h @ w2 + b2
    value = h @ w3 + b3
    return jax.nn.softmax(logits, axis=-1), value


if __name__ == "__main__":
    key = jax.random.PRNGKey(0)
    k_x, k_p = jax.random.split(key)
    raw_params = init_params(k_p)
    fused_params = prepare_params(*raw_params)          # one-time prep, reused
    fused_params = jax.block_until_ready(fused_params)

    # ---- small batch (per-env-step style) ----
    B = 4
    x = jax.random.normal(k_x, (B, IN_DIM), jnp.float32)
    action_prob, state_values = policy_forward(x, *fused_params)
    jax.block_until_ready((action_prob, state_values))

    assert action_prob.shape == (B, N_ACT) and state_values.shape == (B, 1)
    assert bool(jnp.all(jnp.isfinite(action_prob)))
    assert bool(jnp.all(jnp.isfinite(state_values)))
    assert jnp.allclose(jnp.sum(action_prob, axis=-1), 1.0, atol=1e-5)

    p_ref, v_ref = _reference(x, *raw_params)
    assert jnp.allclose(action_prob, p_ref, atol=2e-2)
    assert jnp.allclose(state_values, v_ref, atol=5e-2)

    # ---- non-multiple-of-8 batch: exercises the padded single-step path ----
    B1 = 5
    x1 = jax.random.normal(jax.random.PRNGKey(1), (B1, IN_DIM), jnp.float32)
    p1, v1 = policy_forward(x1, *fused_params)
    jax.block_until_ready((p1, v1))
    assert p1.shape == (B1, N_ACT) and v1.shape == (B1, 1)
    p1_ref, v1_ref = _reference(x1, *raw_params)
    assert jnp.allclose(p1, p1_ref, atol=2e-2)
    assert jnp.allclose(v1, v1_ref, atol=5e-2)

    # ---- larger batch: exercises multi-step grid + padded tail tile ----
    B2 = 1000
    x2 = jax.random.normal(jax.random.PRNGKey(2), (B2, IN_DIM), jnp.float32)
    p2, v2 = policy_forward(x2, *fused_params, tm=256)
    jax.block_until_ready((p2, v2))
    assert p2.shape == (B2, N_ACT) and v2.shape == (B2, 1)
    assert jnp.allclose(jnp.sum(p2, axis=-1), 1.0, atol=1e-5)
    p2_ref, v2_ref = _reference(x2, *raw_params)
    assert jnp.allclose(p2, p2_ref, atol=2e-2)
    assert jnp.allclose(v2, v2_ref, atol=5e-2)

    print("KERNEL_OK")
</pallas_src>

<mosaic_0001>
module attributes {stable_mosaic.version = 11 : i64} {
  func.func @_policy_kernel(%arg0: i32, %arg1: memref<4x8xf32, #tpu.memory_space<vmem>>, %arg2: memref<128x4xf32, #tpu.memory_space<vmem>>, %arg3: memref<128x1xf32, #tpu.memory_space<vmem>>, %arg4: memref<8x128xf32, #tpu.memory_space<vmem>>, %arg5: memref<8x1xf32, #tpu.memory_space<vmem>>, %arg6: memref<8x8xf32, #tpu.memory_space<vmem>>) attributes {dimension_semantics = [#tpu.dimension_semantics<parallel>], iteration_bounds = array<i64: 1>, scalar_prefetch = 0 : i64, scratch_operands = 0 : i64, tpu.core_type = #tpu.core_type<tc>, window_params = [{transform_indices = @transform_0, window_bounds = array<i64: 4, 8>}, {pipeline_mode = #tpu.pipeline_mode<synchronous>, transform_indices = @transform_1, window_bounds = array<i64: 128, 4>}, {pipeline_mode = #tpu.pipeline_mode<synchronous>, transform_indices = @transform_2, window_bounds = array<i64: 128, 1>}, {pipeline_mode = #tpu.pipeline_mode<synchronous>, transform_indices = @transform_3, window_bounds = array<i64: 8, 128>}, {pipeline_mode = #tpu.pipeline_mode<synchronous>, transform_indices = @transform_4, window_bounds = array<i64: 8, 1>}, {transform_indices = @transform_5, window_bounds = array<i64: 8, 8>}]} {
    %c0 = arith.constant 0 : index
    %c0_0 = arith.constant 0 : index
    %0 = vector.load %arg1[%c0, %c0_0] : memref<4x8xf32, #tpu.memory_space<vmem>>, vector<4x8xf32>
    %c0_1 = arith.constant 0 : index
    %c0_2 = arith.constant 0 : index
    %1 = vector.load %arg2[%c0_1, %c0_2] : memref<128x4xf32, #tpu.memory_space<vmem>>, vector<128x4xf32>
    %cst = arith.constant dense<0.000000e+00> : vector<128x8xf32>
    %2 = tpu.matmul %1, %0, %cst {dimension_numbers = #tpu.dot_dimension_numbers<[1], [0], [0], [1], [0, 0, 1, 1], [], []>} : vector<128x4xf32>, vector<4x8xf32>, vector<128x8xf32> -> vector<128x8xf32>
    %c0_3 = arith.constant 0 : index
    %c0_4 = arith.constant 0 : index
    %3 = vector.load %arg3[%c0_3, %c0_4] : memref<128x1xf32, #tpu.memory_space<vmem>>, vector<128x1xf32>
    %4 = vector.broadcast %3 : vector<128x1xf32> to vector<128x8xf32>
    %5 = arith.addf %2, %4 : vector<128x8xf32>
    %cst_5 = arith.constant 0.000000e+00 : f32
    %6 = vector.broadcast %cst_5 : f32 to vector<128x8xf32>
    %7 = arith.maximumf %5, %6 : vector<128x8xf32>
    %c0_6 = arith.constant 0 : index
    %c0_7 = arith.constant 0 : index
    %8 = vector.load %arg4[%c0_6, %c0_7] : memref<8x128xf32, #tpu.memory_space<vmem>>, vector<8x128xf32>
    %cst_8 = arith.constant dense<0.000000e+00> : vector<8x8xf32>
    %9 = tpu.matmul %8, %7, %cst_8 {dimension_numbers = #tpu.dot_dimension_numbers<[1], [0], [0], [1], [0, 0, 1, 1], [], []>} : vector<8x128xf32>, vector<128x8xf32>, vector<8x8xf32> -> vector<8x8xf32>
    %c0_9 = arith.constant 0 : index
    %c0_10 = arith.constant 0 : index
    %10 = vector.load %arg5[%c0_9, %c0_10] : memref<8x1xf32, #tpu.memory_space<vmem>>, vector<8x1xf32>
    %11 = vector.broadcast %10 : vector<8x1xf32> to vector<8x8xf32>
    %12 = arith.addf %9, %11 : vector<8x8xf32>
    %13 = vector.extract_strided_slice %12 {offsets = [0, 0], sizes = [1, 8], strides = [1, 1]} : vector<8x8xf32> to vector<1x8xf32>
    %14 = vector.extract_strided_slice %12 {offsets = [1, 0], sizes = [1, 8], strides = [1, 1]} : vector<8x8xf32> to vector<1x8xf32>
    %15 = arith.subf %13, %14 : vector<1x8xf32>
    %cst_11 = arith.constant -6.000000e+01 : f32
    %cst_12 = arith.constant 6.000000e+01 : f32
    %16 = vector.broadcast %cst_11 : f32 to vector<1x8xf32>
    %17 = arith.maximumf %16, %15 : vector<1x8xf32>
    %18 = vector.broadcast %cst_12 : f32 to vector<1x8xf32>
    %19 = arith.minimumf %18, %17 : vector<1x8xf32>
    %cst_13 = arith.constant 0.000000e+00 : f32
    %20 = vector.broadcast %cst_13 : f32 to vector<1x8xf32>
    %21 = arith.subf %20, %19 : vector<1x8xf32>
    %22 = math.exp %21 : vector<1x8xf32>
    %cst_14 = arith.constant 1.000000e+00 : f32
    %23 = vector.broadcast %cst_14 : f32 to vector<1x8xf32>
    %24 = arith.addf %23, %22 : vector<1x8xf32>
    %cst_15 = arith.constant 1.000000e+00 : f32
    %25 = vector.broadcast %cst_15 : f32 to vector<1x8xf32>
    %26 = arith.divf %25, %24 : vector<1x8xf32>
    %cst_16 = arith.constant 1.000000e+00 : f32
    %27 = vector.broadcast %cst_16 : f32 to vector<1x8xf32>
    %28 = arith.subf %27, %26 : vector<1x8xf32>
    %29 = tpu.iota {dimensions = array<i32: 0>} : vector<8x8xi32>
    %c0_i32 = arith.constant 0 : i32
    %30 = vector.broadcast %c0_i32 : i32 to vector<8x8xi32>
    %31 = arith.cmpi eq, %29, %30 : vector<8x8xi32>
    %c1_i32 = arith.constant 1 : i32
    %32 = vector.broadcast %c1_i32 : i32 to vector<8x8xi32>
    %33 = arith.cmpi eq, %29, %32 : vector<8x8xi32>
    %34 = vector.shape_cast %28 : vector<1x8xf32> to vector<1x8xf32>
    %35 = vector.broadcast %34 : vector<1x8xf32> to vector<8x8xf32>
    %36 = arith.select %33, %35, %12 : vector<8x8xi1>, vector<8x8xf32>
    %37 = vector.shape_cast %26 : vector<1x8xf32> to vector<1x8xf32>
    %38 = vector.broadcast %37 : vector<1x8xf32> to vector<8x8xf32>
    %39 = arith.select %31, %38, %36 : vector<8x8xi1>, vector<8x8xf32>
    %c0_17 = arith.constant 0 : index
    %c0_18 = arith.constant 0 : index
    %40 = vector.load %arg6[%c0_17, %c0_18] : memref<8x8xf32, #tpu.memory_space<vmem>>, vector<8x8xf32>
    tpu.vector_store %arg6[%c0_17, %c0_18], %39 {strides = array<i32>} : memref<8x8xf32, #tpu.memory_space<vmem>>, vector<8x8xf32>,
    return
  }
  func.func @transform_0(%arg0: i32) -> (i32, i32) {
    %c0_i32 = arith.constant 0 : i32
    %c0_i32_0 = arith.constant 0 : i32
    return %c0_i32, %arg0 : i32, i32
  }
  func.func @transform_1(%arg0: i32) -> (i32, i32) {
    %c0_i32 = arith.constant 0 : i32
    %c0_i32_0 = arith.constant 0 : i32
    %c0_i32_1 = arith.constant 0 : i32
    return %c0_i32, %c0_i32_0 : i32, i32
  }
  func.func @transform_2(%arg0: i32) -> (i32, i32) {
    %c0_i32 = arith.constant 0 : i32
    %c0_i32_0 = arith.constant 0 : i32
    %c0_i32_1 = arith.constant 0 : i32
    return %c0_i32, %c0_i32_0 : i32, i32
  }
  func.func @transform_3(%arg0: i32) -> (i32, i32) {
    %c0_i32 = arith.constant 0 : i32
    %c0_i32_0 = arith.constant 0 : i32
    %c0_i32_1 = arith.constant 0 : i32
    return %c0_i32, %c0_i32_0 : i32, i32
  }
  func.func @transform_4(%arg0: i32) -> (i32, i32) {
    %c0_i32 = arith.constant 0 : i32
    %c0_i32_0 = arith.constant 0 : i32
    %c0_i32_1 = arith.constant 0 : i32
    return %c0_i32, %c0_i32_0 : i32, i32
  }
  func.func @transform_5(%arg0: i32) -> (i32, i32) {
    %c0_i32 = arith.constant 0 : i32
    %c0_i32_0 = arith.constant 0 : i32
    return %c0_i32, %arg0 : i32, i32
  }
}

</mosaic_0001>

<bundles_post_ra>
// kernel: policy_forward.1
= control target key start
LH: loop header
LB: loop body
LE: loop exit
PB: predicated region body
PF: predicated region fallthrough
CT: control target
= control target key end

     0   :  { %vm182_vm0 = vcmask 1043456   ;;  %vm133_vm1 = vcmask 31744   ;;  %v604_v3 = vmov 0   ;;  %v605_v35 = vmov 0.0|0.0   ;;  %s770_s0 = inlined_call_operand.vmem [shape: f32[4,8], index: 0, kind: input, shape index: {}]   ;;  %s771_s1 = inlined_call_operand.vmem [shape: f32[128,4], index: 1, kind: input, shape index: {}]   ;;  %s772_s2 = inlined_call_operand.vmem [shape: f32[128,1], index: 2, kind: input, shape index: {}]   ;;  %s773_s4 = inlined_call_operand.vmem [shape: f32[8,1], index: 4, kind: input, shape index: {}]   ;;  %s774_s3 = inlined_call_operand.vmem [shape: f32[8,128], index: 3, kind: input, shape index: {}]   ;;  %s775_s5 = inlined_call_operand.vmem [shape: f32[8,8], index: 5, kind: output, shape index: {}]  }
   0x1   :  { %v20_v0 = vld [vmem:[%s770_s0] sm:$0xf]  ;;  %v22_v2 = vld [vmem:[%s771_s1 + $0x8] sm:$0xff]  ;;  %598 = vset.pattern.permute.xlu0 %v604_v3  ;;  %599 = vset.pattern.permute.xlu1 %v604_v3  ;;  %v23_v4 = vld [vmem:[%s771_s1 + $0x10] sm:$0xff]  ;;  %vm606_vm2 = vmmov 0   ;;  %v607_v36 = vmov 0.0  }
   0x2   :  { %v21_v1 = vld [vmem:[%s771_s1] sm:$0xff]  ;;  %509 = vmatprep.subr.msk.mxu0 %vm182_vm0, %v20_v0  ;;  %v24_v5 = vld [vmem:[%s771_s1 + $0x18] sm:$0xff]  ;;  %v39_v8 = vld [vmem:[%s772_s2 + $0x10] sm:$0xff]  ;;  %570 = vmatprep.subr.bf16.mxu1 %v605_v35  ;;  %vm451_vm5 = vcmask 64512  }
   0x3   :  { %511 = vmatprep.mubr.msk.f32.mxu0 %vm133_vm1, %v21_v1  ;;  %510 = vmatpush3.msk.msra.mxu0 %vm182_vm0, %v20_v0  ;;  %v25_v6 = vld [vmem:[%s771_s1 + $0x20] sm:$0xff]  ;;  %v38_v9 = vld [vmem:[%s772_s2 + $0x8] sm:$0xff]  ;;  %v40_v11 = vld [vmem:[%s772_s2 + $0x18] sm:$0xff] }
   0x4   :  { %512 = vmatmul.mubr.msk.f32.vlgmr.msra.gmra.mrb[0].mxu0 %vm133_vm1, %v22_v2  ;;  %v37_v7 = vld [vmem:[%s772_s2] sm:$0xff]  ;;  %65 = vperm.xlu1 %599, %v39_v8   ;;  %v26_v10 = vld [vmem:[%s771_s1 + $0x28] sm:$0xff]  ;;  %v27_v12 = vld [vmem:[%s771_s1 + $0x30] sm:$0xff] }
   0x5   :  { %514 = vmatprep.mubr.msk.f32.mxu0 %vm133_vm1, %v23_v4  ;;  %55 = vperm.xlu0 %598, %v37_v7   ;;  %v41_v13 = vld [vmem:[%s772_s2 + $0x20] sm:$0xff]  ;;  %v28_v14 = vld [vmem:[%s771_s1 + $0x38] sm:$0xff]  ;;  %v42_v15 = vld [vmem:[%s772_s2 + $0x28] sm:$0xff] }
   0x6   :  { %v29_v16 = vld [vmem:[%s771_s1 + $0x40] sm:$0xff]  ;;  %v43_v17 = vld [vmem:[%s772_s2 + $0x30] sm:$0xff]  ;;  %v30_v18 = vld [vmem:[%s771_s1 + $0x48] sm:$0xff]  ;;  %567 = vmatprep.mubr.msk.f32.mxu1 %vm606_vm2, %v607_v36 }
   0x7   :  { %v44_v19 = vld [vmem:[%s772_s2 + $0x38] sm:$0xff]  ;;  %v31_v20 = vld [vmem:[%s771_s1 + $0x50] sm:$0xff]  ;;  %v45_v21 = vld [vmem:[%s772_s2 + $0x40] sm:$0xff] }
   0x8   :  { %515 = vmatmul.mubr.msk.f32.gmra.mrb[2].mxu0 %vm133_vm1, %v24_v5  ;;  %70 = vperm.xlu1 %599, %v40_v11   ;;  %v32_v22 = vld [vmem:[%s771_s1 + $0x58] sm:$0xff]  ;;  %v46_v23 = vld [vmem:[%s772_s2 + $0x48] sm:$0xff]  ;;  %v33_v24 = vld [vmem:[%s771_s1 + $0x60] sm:$0xff] }
   0x9   :  { %517 = vmatprep.mubr.msk.f32.mxu0 %vm133_vm1, %v25_v6  ;;  %60 = vperm.xlu0 %598, %v38_v9   ;;  %v47_v25 = vld [vmem:[%s772_s2 + $0x50] sm:$0xff]  ;;  %v34_v26 = vld [vmem:[%s771_s1 + $0x68] sm:$0xff]  ;;  %v48_v27 = vld [vmem:[%s772_s2 + $0x58] sm:$0xff] }
   0xa   :  { %v35_v28 = vld [vmem:[%s771_s1 + $0x70] sm:$0xff]  ;;  %v49_v29 = vld [vmem:[%s772_s2 + $0x60] sm:$0xff]  ;;  %v36_v30 = vld [vmem:[%s771_s1 + $0x78] sm:$0xff] }
   0xb   :  { %v50_v31 = vld [vmem:[%s772_s2 + $0x68] sm:$0xff]  ;;  %v51_v32 = vld [vmem:[%s772_s2 + $0x70] sm:$0xff]  ;;  %v52_v33 = vld [vmem:[%s772_s2 + $0x78] sm:$0xff] }
   0xc   :  { %518 = vmatmul.mubr.msk.f32.gmra.mrb[4].mxu0 %vm133_vm1, %v26_v10  ;;  %80 = vperm.xlu1 %599, %v42_v15   ;;  %v348_v34 = vld [vmem:[%s773_s4] sm:$0xff] }
   0xd   :  { %520 = vmatprep.mubr.msk.f32.mxu0 %vm133_vm1, %v27_v12  ;;  %75 = vperm.xlu0 %598, %v41_v13  }
  0x10   :  { %521 = vmatmul.mubr.msk.f32.gmra.mrb[6].mxu0 %vm133_vm1, %v28_v14  ;;  %90 = vperm.xlu1 %599, %v44_v19  }
  0x11   :  { %523 = vmatprep.mubr.msk.f32.mxu0 %vm133_vm1, %v29_v16  ;;  %85 = vperm.xlu0 %598, %v43_v17  }
  0x14   :  { %524 = vmatmul.mubr.msk.f32.gmra.mrb[8].mxu0 %vm133_vm1, %v30_v18  ;;  %100 = vperm.xlu1 %599, %v46_v23  }
  0x15   :  { %526 = vmatprep.mubr.msk.f32.mxu0 %vm133_vm1, %v31_v20  ;;  %95 = vperm.xlu0 %598, %v45_v21  }
  0x18   :  { %527 = vmatmul.mubr.msk.f32.gmra.mrb[10].mxu0 %vm133_vm1, %v32_v22  ;;  %110 = vperm.xlu1 %599, %v48_v27  }
  0x19   :  { %529 = vmatprep.mubr.msk.f32.mxu0 %vm133_vm1, %v33_v24  ;;  %105 = vperm.xlu0 %598, %v47_v25  }
  0x1c   :  { %530 = vmatmul.mubr.msk.f32.gmra.mrb[12].mxu0 %vm133_vm1, %v34_v26  ;;  %120 = vperm.xlu1 %599, %v50_v31  }
  0x1d   :  { %532 = vmatprep.mubr.msk.f32.mxu0 %vm133_vm1, %v35_v28  ;;  %115 = vperm.xlu0 %598, %v49_v29  }
  0x20   :  { %533 = vmatmul.mubr.msk.f32.gmra.mrb[14].mxu0 %vm133_vm1, %v36_v30  ;;  %130 = vperm.xlu1 %599, %v52_v33  }
  0x21   :  { %125 = vperm.xlu0 %598, %v51_v32  }
  0x25   :  { %351 = vperm.xlu0 %598, %v348_v34  }
  0x83   :  { %v66_v37 = vpop.permute.xlu1 %65 }
  0x84   :  { %v56_v38 = vpop.permute.xlu0 %55 }
  0x87   :  { %v71_v39 = vpop.permute.xlu1 %70 }
  0x88   :  { %v61_v40 = vpop.permute.xlu0 %60 }
  0x8b   :  { %v81_v41 = vpop.permute.xlu1 %80 }
  0x8c   :  { %v76_v42 = vpop.permute.xlu0 %75 }
  0x8f   :  { %v91_v48 = vpop.permute.xlu1 %90 }
  0x90   :  { %v86_v51 = vpop.permute.xlu0 %85 }
  0x93   :  { %v101_v61 = vpop.permute.xlu1 %100 }
  0x94   :  { %v96_v0 = vpop.permute.xlu0 %95 }
  0x97   :  { %v111_v9 = vpop.permute.xlu1 %110 }
  0x98   :  { %v106_v12 = vpop.permute.xlu0 %105 }
  0x9b   :  { %v121_v22 = vpop.permute.xlu1 %120 }
  0x9c   :  { %v116_v25 = vpop.permute.xlu0 %115 }
  0x9f   :  { %v131_v34 = vpop.permute.xlu1 %130 }
  0xd7   :  { %v513_v43 = vpop.f32.mrb[0].mxu0 }
  0xd8   :  { %v258_v44 = vadd.f32 %v513_v43, %v61_v40  ;;  %v252_v45 = vpop.f32.mrb[1].mxu0 }
  0xd9   :  { %v253_v46 = vadd.f32 %v252_v45, %v56_v38  ;;  %v126_v38 = vpop.permute.xlu0 %125 }
  0xda   :  { %v332_v47 = vmax.f32 %v258_v44, 0.0 }
  0xdb   :  { %v331_v49 = vmax.f32 %v253_v46, 0.0  ;;  %v516_v50 = vpop.f32.mrb[2].mxu0  ;;  %v347_v46 = vld [vmem:[%s774_s3] sm:$0xff] }
  0xdc   :  { %v268_v52 = vadd.f32 %v516_v50, %v71_v39  ;;  %v262_v53 = vpop.f32.mrb[3].mxu0 }
  0xdd   :  { %v263_v54 = vadd.f32 %v262_v53, %v66_v37  ;;  %v571_v55 = vpack.c.bf16 %v332_v47, %v331_v49  ;;  %v352_v47 = vpop.permute.xlu0 %351 }
  0xde   :  { %v334_v56 = vmax.f32 %v268_v52, 0.0 }
  0xdf   :  { %v333_v57 = vmax.f32 %v263_v54, 0.0  ;;  %v519_v58 = vpop.f32.mrb[4].mxu0  ;;  %572 = vmatpush3.bf16.msra.mxu1 %v571_v55 }
  0xe0   :  { %v278_v59 = vadd.f32 %v519_v58, %v81_v41  ;;  %v272_v60 = vpop.f32.mrb[5].mxu0  ;;  %573 = vmatprep.subr.bf16.mxu1 %v605_v35 }
  0xe1   :  { %v574_v62 = vpack.c.bf16 %v334_v56, %v333_v57  ;;  %v273_v63 = vadd.f32 %v272_v60, %v76_v42 }
  0xe2   :  { %v336_v1 = vmax.f32 %v278_v59, 0.0 }
  0xe3   :  { %v335_v2 = vmax.f32 %v273_v63, 0.0  ;;  %v522_v3 = vpop.f32.mrb[6].mxu0  ;;  %575 = vmatpush3.bf16.msra.mxu1 %v574_v62 }
  0xe4   :  { %v288_v4 = vadd.f32 %v522_v3, %v91_v48  ;;  %v282_v5 = vpop.f32.mrb[7].mxu0  ;;  %576 = vmatprep.subr.bf16.mxu1 %v605_v35 }
  0xe5   :  { %v577_v6 = vpack.c.bf16 %v336_v1, %v335_v2  ;;  %v283_v7 = vadd.f32 %v282_v5, %v86_v51 }
  0xe6   :  { %v338_v8 = vmax.f32 %v288_v4, 0.0 }
  0xe7   :  { %v337_v10 = vmax.f32 %v283_v7, 0.0  ;;  %v525_v11 = vpop.f32.mrb[8].mxu0  ;;  %578 = vmatpush3.bf16.msra.mxu1 %v577_v6 }
  0xe8   :  { %v298_v13 = vadd.f32 %v525_v11, %v101_v61  ;;  %v292_v14 = vpop.f32.mrb[9].mxu0  ;;  %579 = vmatprep.subr.bf16.mxu1 %v605_v35 }
  0xe9   :  { %v580_v15 = vpack.c.bf16 %v338_v8, %v337_v10  ;;  %v293_v16 = vadd.f32 %v292_v14, %v96_v0 }
  0xea   :  { %v340_v17 = vmax.f32 %v298_v13, 0.0 }
  0xeb   :  { %v339_v18 = vmax.f32 %v293_v16, 0.0  ;;  %v528_v19 = vpop.f32.mrb[10].mxu0  ;;  %581 = vmatpush3.bf16.msra.mxu1 %v580_v15 }
  0xec   :  { %v308_v20 = vadd.f32 %v528_v19, %v111_v9  ;;  %v302_v21 = vpop.f32.mrb[11].mxu0  ;;  %582 = vmatprep.subr.bf16.mxu1 %v605_v35 }
  0xed   :  { %v583_v23 = vpack.c.bf16 %v340_v17, %v339_v18  ;;  %v303_v24 = vadd.f32 %v302_v21, %v106_v12 }
  0xee   :  { %v342_v26 = vmax.f32 %v308_v20, 0.0 }
  0xef   :  { %v341_v27 = vmax.f32 %v303_v24, 0.0  ;;  %v531_v28 = vpop.f32.mrb[12].mxu0  ;;  %584 = vmatpush3.bf16.msra.mxu1 %v583_v23 }
  0xf0   :  { %v318_v29 = vadd.f32 %v531_v28, %v121_v22  ;;  %v312_v30 = vpop.f32.mrb[13].mxu0  ;;  %585 = vmatprep.subr.bf16.mxu1 %v605_v35 }
  0xf1   :  { %v586_v31 = vpack.c.bf16 %v342_v26, %v341_v27  ;;  %v313_v32 = vadd.f32 %v312_v30, %v116_v25 }
  0xf2   :  { %v344_v33 = vmax.f32 %v318_v29, 0.0 }
  0xf3   :  { %v343_v36 = vmax.f32 %v313_v32, 0.0  ;;  %v534_v37 = vpop.f32.mrb[14].mxu0  ;;  %587 = vmatpush3.bf16.msra.mxu1 %v586_v31 }
  0xf4   :  { %v328_v39 = vadd.f32 %v534_v37, %v131_v34  ;;  %v322_v40 = vpop.f32.mrb[15].mxu0  ;;  %588 = vmatprep.subr.bf16.mxu1 %v605_v35 }
  0xf5   :  { %v589_v41 = vpack.c.bf16 %v344_v33, %v343_v36  ;;  %v323_v42 = vadd.f32 %v322_v40, %v126_v38 }
  0xf6   :  { %v346_v43 = vmax.f32 %v328_v39, 0.0 }
  0xf7   :  { %v345_v44 = vmax.f32 %v323_v42, 0.0  ;;  %590 = vmatpush3.bf16.msra.mxu1 %v589_v41 }
  0xf8   :  { %591 = vmatprep.subr.bf16.mxu1 %v605_v35  ;;  %v437_v35 = vlaneseq }
  0xf9   :  { %v592_v45 = vpack.c.bf16 %v346_v43, %v345_v44 }
  0xfa   :  { %v438_v58 = vshrl.u32 %v437_v35, 7 }
  0xfb   :  { %593 = vmatpush3.bf16.msra.mxu1 %v592_v45 }
  0xfc   :  { %v443_v60 = vsub.s32 0, %v438_v58  ;;  %vm440_vm3 = vcmp.eq.s32.totalorder %v438_v58, 1  ;;  %vm439_vm4 = vcmp.eq.s32.totalorder %v438_v58, 0 }
  0xfe   :  { %568 = vmatmul.mubr.f32.vlgmr.msra.gmra.mrb[0].mxu1 %v347_v46 }
 0x1d1   :  { %v420_v48 = vpop.f32.mrb[0].mxu1 }
 0x1d2   :  { %v421_v49 = vadd.f32 %v420_v48, %v352_v47  ;;  %v569_v50 = vpop.f32.mrb[1].mxu1 }
 0x1d4   :  { %v425_v51 = vrot.slane %v421_v49, 1 }
 0x1d6   :  { %v427_v52 = vsub.f32 %v421_v49, %v425_v51 }
 0x1d8   :  { %v474_v53 = vclamps-f32 %v427_v52, 60.0 }
 0x1da   :  { %v430_v54 = vsub.f32 0.0, %v474_v53 }
 0x1dc   :  { %v431_v55 = vmul.f32 1.442695, %v430_v54 }
 0x1de   :  { %600 = vpow2.f32 %v431_v55 }
 0x1e8   :  { %v601_v56 = vpop.eup %600 }
 0x1e9   :  { %v433_v57 = vadd.f32 1.0, %v601_v56 }
 0x1eb   :  { %602 = vrcp.f32 %v433_v57 }
 0x1f5   :  { %v603_v59 = vpop.eup %602 }
 0x1f6   :  { %v436_v61 = vsub.f32 1.0, %v603_v59  ;;  %v449_v63 = vrot.slane %v603_v59, %v443_v60 }
 0x1f8   :  { %v444_v62 = vrot.slane %v436_v61, %v443_v60 }
 0x1fa   :  { %v445_v0 = vsel %vm440_vm3, %v444_v62, %v421_v49 }
 0x1fb   :  { %v450_v1 = vsel %vm439_vm4, %v449_v63, %v445_v0 }
 0x1fc   :  { %452 = vst.msk [vmem:[%s775_s5] sm:$0xff] %vm451_vm5, %v450_v1 }

</bundles_post_ra>
